<compile_context>
chip_gen: v7x
topology: tpu7x:2x2x1
jax: 0.10.0
libtpu: 0.0.40
codegen_flags: <defaults>
</compile_context>

<pallas_src>
import jax
import jax.numpy as jnp
from jax.experimental import pallas as pl
from jax.experimental.pallas import tpu as pltpu


def _l1p_matmul_kernel(x_ref, beta_rows_ref, beta0_ref, y_ref):
    # Hot path: (TN, D) @ (D, Q) + broadcasted bias row.  Memory-bound; the
    # MXU shape is irrelevant at D=32, Q=8, so no K/N tiling is attempted.
    y_ref[...] = (
        jnp.dot(x_ref[...], beta_rows_ref[...],
                preferred_element_type=jnp.float32)
        + beta0_ref[...]
    ).astype(y_ref.dtype)


def _round_up(x, m):
    return ((x + m - 1) // m) * m


def l1_p_forward(inputs, delta_0_matrix, delta_coef_matrix, *, tile_n=2048):
    """Pallas implementation of l1_p.forward. Returns (predicted_y, penalty)."""
    # ---- parameter setup (tiny, stays in plain JAX) ----
    delta_mat = jnp.concatenate([delta_0_matrix, delta_coef_matrix], axis=0)
    beta_mat = jnp.cumsum(delta_mat, axis=1)            # t(cumsum(t(.), 0))
    beta_rows = beta_mat[1:, :]                          # (D, Q)
    beta0 = beta_mat[0:1, :]                             # (1, Q)

    # ---- penalty (parameter-only reduction, evicted from the kernel) ----
    delta_vec = delta_mat[1:, 1:]                        # (D, Q-1)
    delta_0_vec = delta_mat[0:1, 1:]                     # (1, Q-1)
    delta_minus_sum = jnp.sum(jnp.maximum(0.0, -delta_vec),
                              axis=0, keepdims=True)     # (1, Q-1)
    clipped = jnp.maximum(delta_0_vec, delta_minus_sum)  # clip(min=.., max=inf)
    penalty = jnp.mean(jnp.abs(delta_0_vec - clipped))

    if inputs.ndim != beta_mat.ndim:
        inputs = jnp.squeeze(inputs, axis=1)

    N, D = inputs.shape
    Q = beta_mat.shape[1]

    # Row tile: multiple of 8 (f32 sublane), capped by the (padded) batch.
    # Lane padding note: (tn, 32) and (tn, 8) f32 blocks both pad the last dim
    # to 128 lanes in VMEM -> ~tn*128*4 B per buffer (x2 for double buffering);
    # tn=2048 => ~4 MiB total, comfortably under the 16/32/32 MiB scoped VMEM
    # defaults on v5e/v6e/v7x.
    tn = min(tile_n, _round_up(N, 8))
    tn = max(8, (tn // 8) * 8)

    # Pad the batch so the grid covers it exactly; extra rows are zero and are
    # sliced off the output.
    n_blocks = pl.cdiv(N, tn)
    N_pad = n_blocks * tn
    if N_pad != N:
        inputs_p = jnp.zeros((N_pad, D), dtype=inputs.dtype).at[:N, :].set(inputs)
    else:
        inputs_p = inputs

    cost = pl.CostEstimate(
        flops=2 * N_pad * D * Q,
        transcendentals=0,
        bytes_accessed=4 * (N_pad * D + D * Q + N_pad * Q),
    )

    y_pad = pl.pallas_call(
        _l1p_matmul_kernel,
        out_shape=jax.ShapeDtypeStruct((N_pad, Q), jnp.float32),
        grid_spec=pltpu.PrefetchScalarGridSpec(
            num_scalar_prefetch=0,
            grid=(n_blocks,),
            in_specs=[
                pl.BlockSpec((tn, D), lambda i: (i, 0)),   # inputs tile
                pl.BlockSpec((D, Q), lambda i: (0, 0)),    # beta_mat[1:, :]
                pl.BlockSpec((1, Q), lambda i: (0, 0)),    # beta_mat[0:1, :]
            ],
            out_specs=pl.BlockSpec((tn, Q), lambda i: (i, 0)),
        ),
        compiler_params=pltpu.CompilerParams(
            # Batch grid is embarrassingly parallel (penalty no longer lives
            # in the kernel) -> shard across both TCs on v7x; no-op elsewhere.
            dimension_semantics=("parallel",)),
        cost_estimate=cost,
    )(inputs_p, beta_rows, beta0)

    y = y_pad[:N, :] if N_pad != N else y_pad
    return y, penalty


def _reference(inputs, delta_0_matrix, delta_coef_matrix):
    """Pure-JAX reference mirroring the PyTorch forward."""
    delta_mat = jnp.concatenate([delta_0_matrix, delta_coef_matrix], axis=0)
    beta_mat = jnp.cumsum(delta_mat, axis=1)
    delta_vec = delta_mat[1:, 1:]
    delta_0_vec = delta_mat[0:1, 1:]
    delta_minus_sum = jnp.sum(jnp.maximum(0.0, -delta_vec), axis=0)
    clipped = jnp.maximum(delta_0_vec, delta_minus_sum.reshape(delta_0_vec.shape))
    if inputs.ndim != beta_mat.ndim:
        inputs = jnp.squeeze(inputs, axis=1)
    predicted_y = inputs @ beta_mat[1:, :] + beta_mat[0, :]
    penalty = jnp.mean(jnp.abs(delta_0_vec - clipped))
    return predicted_y, penalty


if __name__ == "__main__":
    # Small shapes consistent with the module: size_in=32, number_of_quantiles=8.
    D, Q = 32, 8
    key = jax.random.PRNGKey(0)
    kx, k0, kc, kx2 = jax.random.split(key, 4)

    # Deterministic "Gaussian" prior initialization (normal(0, 1)).
    delta_0_matrix = jax.random.normal(k0, (1, Q), dtype=jnp.float32)
    delta_coef_matrix = jax.random.normal(kc, (D, Q), dtype=jnp.float32)

    ok = True

    # Case 1: small batch, multiple of 8.
    N1 = 8
    inputs1 = jax.random.normal(kx, (N1, D), dtype=jnp.float32)
    y1, pen1 = l1_p_forward(inputs1, delta_0_matrix, delta_coef_matrix)
    jax.block_until_ready((y1, pen1))
    y1_ref, pen1_ref = _reference(inputs1, delta_0_matrix, delta_coef_matrix)
    ok &= bool(jnp.allclose(y1, y1_ref, atol=1e-4, rtol=1e-4))
    ok &= bool(jnp.allclose(pen1, pen1_ref, atol=1e-5, rtol=1e-5))

    # Case 2: ragged batch (exercises cdiv + zero-pad tail handling).
    N2 = 20
    inputs2 = jax.random.normal(kx2, (N2, D), dtype=jnp.float32)
    y2, pen2 = l1_p_forward(inputs2, delta_0_matrix, delta_coef_matrix)
    jax.block_until_ready((y2, pen2))
    y2_ref, pen2_ref = _reference(inputs2, delta_0_matrix, delta_coef_matrix)
    ok &= bool(jnp.allclose(y2, y2_ref, atol=1e-4, rtol=1e-4))
    ok &= bool(jnp.allclose(pen2, pen2_ref, atol=1e-5, rtol=1e-5))

    assert ok, "mismatch vs reference"
    print("KERNEL_OK")
</pallas_src>

<mosaic_0001>
module attributes {stable_mosaic.version = 11 : i64} {
  func.func @_l1p_matmul_kernel(%arg0: i32, %arg1: memref<8x32xf32, #tpu.memory_space<vmem>>, %arg2: memref<32x8xf32, #tpu.memory_space<vmem>>, %arg3: memref<1x8xf32, #tpu.memory_space<vmem>>, %arg4: memref<8x8xf32, #tpu.memory_space<vmem>>) attributes {dimension_semantics = [#tpu.dimension_semantics<parallel>], iteration_bounds = array<i64: 1>, scalar_prefetch = 0 : i64, scratch_operands = 0 : i64, tpu.core_type = #tpu.core_type<tc>, window_params = [{transform_indices = @transform_0, window_bounds = array<i64: 8, 32>}, {pipeline_mode = #tpu.pipeline_mode<synchronous>, transform_indices = @transform_1, window_bounds = array<i64: 32, 8>}, {pipeline_mode = #tpu.pipeline_mode<synchronous>, transform_indices = @transform_2, window_bounds = array<i64: 1, 8>}, {transform_indices = @transform_3, window_bounds = array<i64: 8, 8>}]} {
    %c0 = arith.constant 0 : index
    %c0_0 = arith.constant 0 : index
    %0 = vector.load %arg1[%c0, %c0_0] : memref<8x32xf32, #tpu.memory_space<vmem>>, vector<8x32xf32>
    %c0_1 = arith.constant 0 : index
    %c0_2 = arith.constant 0 : index
    %1 = vector.load %arg2[%c0_1, %c0_2] : memref<32x8xf32, #tpu.memory_space<vmem>>, vector<32x8xf32>
    %cst = arith.constant dense<0.000000e+00> : vector<8x8xf32>
    %2 = tpu.matmul %0, %1, %cst {dimension_numbers = #tpu.dot_dimension_numbers<[1], [0], [0], [1], [0, 0, 1, 1], [], []>} : vector<8x32xf32>, vector<32x8xf32>, vector<8x8xf32> -> vector<8x8xf32>
    %c0_3 = arith.constant 0 : index
    %c0_4 = arith.constant 0 : index
    %3 = vector.load %arg3[%c0_3, %c0_4] : memref<1x8xf32, #tpu.memory_space<vmem>>, vector<1x8xf32>
    %4 = vector.broadcast %3 : vector<1x8xf32> to vector<8x8xf32>
    %5 = arith.addf %2, %4 : vector<8x8xf32>
    %c0_5 = arith.constant 0 : index
    %c0_6 = arith.constant 0 : index
    %6 = vector.load %arg4[%c0_5, %c0_6] : memref<8x8xf32, #tpu.memory_space<vmem>>, vector<8x8xf32>
    tpu.vector_store %arg4[%c0_5, %c0_6], %5 {strides = array<i32>} : memref<8x8xf32, #tpu.memory_space<vmem>>, vector<8x8xf32>,
    return
  }
  func.func @transform_0(%arg0: i32) -> (i32, i32) {
    %c0_i32 = arith.constant 0 : i32
    %c0_i32_0 = arith.constant 0 : i32
    return %arg0, %c0_i32 : i32, i32
  }
  func.func @transform_1(%arg0: i32) -> (i32, i32) {
    %c0_i32 = arith.constant 0 : i32
    %c0_i32_0 = arith.constant 0 : i32
    %c0_i32_1 = arith.constant 0 : i32
    return %c0_i32, %c0_i32_0 : i32, i32
  }
  func.func @transform_2(%arg0: i32) -> (i32, i32) {
    %c0_i32 = arith.constant 0 : i32
    %c0_i32_0 = arith.constant 0 : i32
    %c0_i32_1 = arith.constant 0 : i32
    return %c0_i32, %c0_i32_0 : i32, i32
  }
  func.func @transform_3(%arg0: i32) -> (i32, i32) {
    %c0_i32 = arith.constant 0 : i32
    %c0_i32_0 = arith.constant 0 : i32
    return %arg0, %c0_i32 : i32, i32
  }
}

</mosaic_0001>

<bundles_post_ra>
// kernel: tpu_custom_call.1
= control target key start
LH: loop header
LB: loop body
LE: loop exit
PB: predicated region body
PF: predicated region fallthrough
CT: control target
= control target key end

     0   :  { %v169_v3 = vmov 0.0|0.0   ;;  %vm170_vm0 = vmmov 0   ;;  %v171_v6 = vmov 0.0   ;;  %s223_s0 = inlined_call_operand.vmem [shape: f32[8,32], index: 0, kind: input, shape index: {}]   ;;  %s224_s1 = inlined_call_operand.vmem [shape: f32[32,8], index: 1, kind: input, shape index: {}]   ;;  %s225_s2 = inlined_call_operand.vmem [shape: f32[1,8], index: 2, kind: input, shape index: {}]   ;;  %s226_s3 = inlined_call_operand.hbm [shape: f32[8,8], index: 3, kind: output, shape index: {}]  }
   0x1   :  { %v16_v0 = vld [vmem:[%s224_s1] sm:$0xff]  ;;  %v17_v1 = vld [vmem:[%s224_s1 + $0x8] sm:$0xff]  ;;  %v18_v2 = vld [vmem:[%s224_s1 + $0x10] sm:$0xff]  ;;  %135 = vmatprep.subr.bf16.mxu0 %v169_v3  ;;  %132 = vmatprep.mubr.msk.f32.mxu0 %vm170_vm0, %v171_v6 }
   0x2   :  { %v136_v4 = vpack.c.bf16 %v17_v1, %v16_v0  ;;  %v19_v5 = vld [vmem:[%s224_s1 + $0x18] sm:$0xff] }
   0x3   :  { %8 = vsyncpa [#allocation3], 0  ;;  %v139_v7 = vpack.c.bf16 %v19_v5, %v18_v2  ;;  %v15_v8 = vld [vmem:[%s223_s0] sm:$0xff]  ;;  %vm27_vm1 = vcmask 261120   ;;  %s172_s24 = smov [#allocation2]   ;;  %vm101_vm2 = vcmask 64512  }
   0x4   :  { %137 = vmatpush3.bf16.msra.mxu0 %v136_v4  ;;  %v117_v9 = vld [vmem:[%s225_s2] ss:$0 sm:$0xff]  ;;  %s109_s1 = sshll.u32 %s172_s24, 4  ;;  %s110_s1 = int_to_ptr.vmem [resolvable:$true] %s109_s1 }
   0x5   :  { %138 = vmatprep.subr.bf16.mxu0 %v169_v3  ;;  %s145_s25 = scalar_lea.vmem %s110_s1, 128  ;;  %p150_p1 = scmp.lt.s32.totalorder %s110_s1, %s110_s1 }
   0x6   :  { %p146_p0 = scmp.ne.s32.totalorder %s110_s1, %s145_s25  ;;  %p151_p2 = scmp.lt.s32.totalorder %s145_s25, %s145_s25 }
   0x8   :  { %140 = vmatpush3.bf16.msra.mxu0 %v139_v7  ;;  %p152_p3 = por %p151_p2, %p150_p1 }
   0xa   :  { %p153_p4 = pnand %p152_p3, %p146_p0 }
   0xb   :  { %133 = vmatmul.mubr.msk.f32.vlgmr.msra.gmra.mrb[0].mxu0 %vm27_vm1, %v15_v8 }
  0xde   :  { %v97_v10 = vpop.f32.mrb[0].mxu0 }
  0xdf   :  { %v98_v11 = vadd.f32 %v117_v9, %v97_v10  ;;  %v134_v12 = vpop.f32.mrb[1].mxu0 }
  0xe1   :  { %102 = vst.msk [vmem:[#allocation2] sm:$0xff] %vm101_vm2, %v98_v11 }
  0xe2   :  { %156 = shalt.err (!%p153_p4)
}
  0xe3   :  { %s157_s27 = scalar_lea.hbm %s226_s3, 128 }
  0xe4   :  { %p158_p5 = scmp.ne.s32.totalorder %s226_s3, %s157_s27  ;;  %p161_p6 = scmp.lt.u32.totalorder %s157_s27, %s226_s3 }
  0xe6   :  { %p163_p7 = pnand %p161_p6, %p158_p5 }
  0xe8   :  { %166 = shalt.err (!%p163_p7)
}
  0xe9   :  { %112 = dma.vmem_to_hbm [thread:$0]  %s110_s1, 128, %s226_s3, [#allocation3]  }
  0xea   :  { %167 = dma.done.wait [#allocation3], 128  }
  0xeb   :  { %168 = vsyncadd [#allocation3], 4294967168 }
  0xec   :  { %116 = vsyncpa [#allocation3], 1 }

</bundles_post_ra>
